<compile_context>
chip_gen: v5e
topology: v5e:2x2
jax: 0.10.0
libtpu: 0.0.40
codegen_flags: <defaults>
</compile_context>

<pallas_src>
import jax
import jax.numpy as jnp
from jax.experimental import pallas as pl
from jax.experimental.pallas import tpu as pltpu


# Conservative count of full-tile f32 temporaries Mosaic materializes in the
# kernel (x, right, down, dr, dd, s) — used for VMEM budgeting.
_F32_TEMPS = 6
_BLOCK_BUDGET_BYTES = 32 << 20   # per-step working set target (v7x-safe)
_VMEM_LIMIT_BYTES = 48 << 20     # explicit scoped-VMEM limit (< v7x 64 MiB phys)


def _sublane_align(dtype):
    """Minimum sublane multiple for a BlockSpec row count of this dtype."""
    return {4: 8, 2: 16, 1: 32}.get(jnp.dtype(dtype).itemsize, 8)


def _tv_partial_kernel(img_ref, rmask_ref, psum_ref):
    # img_ref: (r, w) block = block_nc whole images stacked along rows.
    x = img_ref[...].astype(jnp.float32)
    r, w = x.shape

    # Shifted neighbours via full-tile XLU rotates (no misaligned slice copies).
    #   right[i, j] = x[i, (j + 1) % w]
    #   down [i, j] = x[(i + 1) % r, j]
    right = pltpu.roll(x, shift=w - 1, axis=1)
    down = pltpu.roll(x, shift=r - 1, axis=0)

    dr = x - right
    dd = x - down
    # Precomputed (r, 1) row mask zeroes the last row of every image (which
    # also kills the cross-image and wrap-around "down" terms): 1 vmul/vreg
    # instead of the old iota/mod/compare/select chain.
    s = (dr * dr + dd * dd) * rmask_ref[...]

    # Sublane fold: (r, w) -> (r//8, 8, w) keeps whole 8-row tiles intact
    # (layout-preserving); the sum over the leading dim is pure VALU adds.
    if r % 8 == 0:
        s = s.reshape(r // 8, 8, w).sum(axis=0)            # (8, w)
    else:
        # Whole-tensor fallback block with an unaligned row count.
        s = jnp.sum(s, axis=0, keepdims=True)              # (1, w)

    # Column mask (kills column w-1 and the lane-roll wrap-around), applied on
    # the already-folded tile where it is r/8 times cheaper than full-tile.
    col = jax.lax.broadcasted_iota(jnp.int32, s.shape, 1)
    s = jnp.where(col != (w - 1), s, jnp.float32(0.0))

    # Lane fold to a dense 128-lane tile via 128-aligned static slices
    # (plain vreg adds, no lane-regrouping reshape).
    if w % 128 == 0 and w > 128:
        acc = s[:, :128]
        for b in range(1, w // 128):
            acc = acc + s[:, b * 128:(b + 1) * 128]
        s = acc

    psum_ref[...] = s


def _pick_block_nc(nc, h, w, itemsize, align, budget_bytes=_BLOCK_BUDGET_BYTES):
    """Largest divisor of nc whose true working set fits the VMEM budget."""
    divisors = [bc for bc in range(1, nc + 1) if nc % bc == 0]
    # Row-count alignment is dtype-dependent; the whole-tensor block (bc == nc)
    # is exempt because the block then equals the full array dims.
    aligned = [bc for bc in divisors if (bc * h) % align == 0 or bc == nc]

    def footprint(bc):
        elems = bc * h * w
        # double-buffered input DMA + f32 elementwise temporaries
        return elems * (2 * itemsize + 4 * _F32_TEMPS)

    fitting = [bc for bc in aligned if footprint(bc) <= budget_bytes]
    if fitting:
        return max(fitting)
    # Nothing fits the budget: prefer the smallest aligned block (v7x-safe)
    # rather than degenerating to the whole tensor.
    # TODO(synk): a ragged/clamped last block would keep block sizes near the
    # sweet spot for awkward (e.g. prime) N*C; not needed for these shapes.
    return min(aligned)


def total_variation_loss(syn_img, *, block_nc=None):
    """Scalar TV loss (right_loss + down_loss) computed by the Pallas kernel."""
    n, c, h, w = syn_img.shape
    nc = n * c
    itemsize = jnp.dtype(syn_img.dtype).itemsize
    align = _sublane_align(syn_img.dtype)

    if block_nc is None:
        block_nc = _pick_block_nc(nc, h, w, itemsize, align)
    if nc % block_nc != 0:
        raise ValueError(f"block_nc={block_nc} must divide nc={nc}")
    rows = block_nc * h
    if rows % align != 0 and block_nc != nc:
        raise ValueError(
            f"block rows={rows} not {align}-aligned for dtype {syn_img.dtype}")

    grid = nc // block_nc

    # View as a 2-D (N*C*H, W) slab; trivial (layout-preserving) reshape.
    x2d = syn_img.reshape(nc * h, w)

    # Row mask: zero on the last row of every image; identical for every block
    # (blocks hold whole images), so its BlockSpec index is constant.
    row_mask = (jnp.arange(rows) % h != (h - 1)).astype(jnp.float32)
    row_mask = row_mask.reshape(rows, 1)

    out_sub = 8 if rows % 8 == 0 else 1
    out_w = 128 if w % 128 == 0 else w

    partials = pl.pallas_call(
        _tv_partial_kernel,
        out_shape=jax.ShapeDtypeStruct((grid, out_sub, out_w), jnp.float32),
        grid=(grid,),
        in_specs=[
            pl.BlockSpec((rows, w), lambda i: (i, 0)),
            pl.BlockSpec((rows, 1), lambda i: (0, 0)),
        ],
        out_specs=pl.BlockSpec((None, out_sub, out_w), lambda i: (i, 0, 0)),
        compiler_params=pltpu.CompilerParams(
            dimension_semantics=("parallel",),
            vmem_limit_bytes=_VMEM_LIMIT_BYTES),
    )(x2d, row_mask)

    inv_n = jnp.float32(1.0 / (nc * (h - 1) * (w - 1)))
    return jnp.sum(partials) * inv_n


class TotalVariationLoss:
    """Mirror of the PyTorch module: holds syn_img, forward is identity + loss."""

    def __init__(self, syn_img):
        self.syn_img = syn_img
        self.loss = None

    def forward(self, input_img):
        self.loss = total_variation_loss(self.syn_img)
        return input_img


def _reference_tv_loss(x):
    x = x.astype(jnp.float32)
    orig = x[..., :-1, :-1]
    right = x[..., :-1, 1:]
    down = x[..., 1:, :-1]
    return jnp.mean((orig - right) ** 2) + jnp.mean((orig - down) ** 2)


if __name__ == "__main__":
    key = jax.random.PRNGKey(0)
    k1, k2 = jax.random.split(key)

    # Small NCHW shapes consistent with the module (image-like input).
    syn_img = jax.random.uniform(k1, (2, 4, 16, 16), dtype=jnp.float32)
    input_img = jax.random.uniform(k2, (2, 4, 16, 16), dtype=jnp.float32)

    mod = TotalVariationLoss(syn_img)
    out_img = jax.block_until_ready(mod.forward(input_img))
    loss = jax.block_until_ready(mod.loss)

    ref_loss = _reference_tv_loss(syn_img)
    assert out_img.shape == input_img.shape
    assert jnp.allclose(out_img, input_img)
    assert jnp.allclose(loss, ref_loss, rtol=1e-5, atol=1e-6), (loss, ref_loss)

    # Multi-block (tiled / pipelined / parallel) path.
    loss_tiled = jax.block_until_ready(total_variation_loss(syn_img, block_nc=2))
    assert jnp.allclose(loss_tiled, ref_loss, rtol=1e-5, atol=1e-6), (
        loss_tiled, ref_loss)

    # bf16 input path (dtype-dependent sublane alignment, f32 accumulation).
    syn_bf16 = syn_img.astype(jnp.bfloat16)
    ref_bf16 = _reference_tv_loss(syn_bf16)
    loss_bf16 = jax.block_until_ready(total_variation_loss(syn_bf16, block_nc=4))
    assert jnp.allclose(loss_bf16, ref_bf16, rtol=1e-4, atol=1e-5), (
        loss_bf16, ref_bf16)

    print("KERNEL_OK")
</pallas_src>

<mosaic_0001>
module attributes {stable_mosaic.version = 11 : i64} {
  func.func @_tv_partial_kernel(%arg0: i32, %arg1: memref<128x16xf32, #tpu.memory_space<vmem>>, %arg2: memref<128x1xf32, #tpu.memory_space<vmem>>, %arg3: memref<1x8x16xf32, #tpu.memory_space<vmem>>) attributes {dimension_semantics = [#tpu.dimension_semantics<parallel>], iteration_bounds = array<i64: 1>, scalar_prefetch = 0 : i64, scratch_operands = 0 : i64, tpu.core_type = #tpu.core_type<tc>, window_params = [{transform_indices = @transform_0, window_bounds = array<i64: 128, 16>}, {pipeline_mode = #tpu.pipeline_mode<synchronous>, transform_indices = @transform_1, window_bounds = array<i64: 128, 1>}, {transform_indices = @transform_2, window_bounds = array<i64: 1, 8, 16>}]} {
    %c0 = arith.constant 0 : index
    %c0_0 = arith.constant 0 : index
    %0 = vector.load %arg1[%c0, %c0_0] : memref<128x16xf32, #tpu.memory_space<vmem>>, vector<128x16xf32>
    %c15_i32 = arith.constant 15 : i32
    %1 = tpu.dynamic_rotate %0 by %c15_i32 dim 1 : vector<128x16xf32>, i32 -> vector<128x16xf32>
    %c127_i32 = arith.constant 127 : i32
    %2 = tpu.dynamic_rotate %0 by %c127_i32 dim 0 : vector<128x16xf32>, i32 -> vector<128x16xf32>
    %3 = arith.subf %0, %1 : vector<128x16xf32>
    %4 = arith.subf %0, %2 : vector<128x16xf32>
    %5 = arith.mulf %3, %3 : vector<128x16xf32>
    %6 = arith.mulf %4, %4 : vector<128x16xf32>
    %7 = arith.addf %5, %6 : vector<128x16xf32>
    %c0_1 = arith.constant 0 : index
    %c0_2 = arith.constant 0 : index
    %8 = vector.load %arg2[%c0_1, %c0_2] : memref<128x1xf32, #tpu.memory_space<vmem>>, vector<128x1xf32>
    %9 = vector.broadcast %8 : vector<128x1xf32> to vector<128x16xf32>
    %10 = arith.mulf %7, %9 : vector<128x16xf32>
    %11 = vector.shape_cast %10 : vector<128x16xf32> to vector<16x8x16xf32>
    %cst = arith.constant dense<0.000000e+00> : vector<8x16xf32>
    %12 = vector.multi_reduction <add>, %11, %cst [0] : vector<16x8x16xf32> to vector<8x16xf32>
    %13 = tpu.iota {dimensions = array<i32: 1>} : vector<8x16xi32>
    %c15_i32_3 = arith.constant 15 : i32
    %14 = vector.broadcast %c15_i32_3 : i32 to vector<8x16xi32>
    %15 = arith.cmpi ne, %13, %14 : vector<8x16xi32>
    %cst_4 = arith.constant 0.000000e+00 : f32
    %16 = vector.broadcast %cst_4 : f32 to vector<8x16xf32>
    %17 = arith.select %15, %12, %16 : vector<8x16xi1>, vector<8x16xf32>
    %c0_5 = arith.constant 0 : index
    %c0_6 = arith.constant 0 : index
    %c0_7 = arith.constant 0 : index
    %18 = vector.load %arg3[%c0_5, %c0_6, %c0_7] : memref<1x8x16xf32, #tpu.memory_space<vmem>>, vector<1x8x16xf32>
    %19 = vector.shape_cast %18 : vector<1x8x16xf32> to vector<8x16xf32>
    %20 = vector.shape_cast %17 : vector<8x16xf32> to vector<1x8x16xf32>
    tpu.vector_store %arg3[%c0_5, %c0_6, %c0_7], %20 {strides = array<i32>} : memref<1x8x16xf32, #tpu.memory_space<vmem>>, vector<1x8x16xf32>,
    return
  }
  func.func @transform_0(%arg0: i32) -> (i32, i32) {
    %c0_i32 = arith.constant 0 : i32
    %c0_i32_0 = arith.constant 0 : i32
    return %arg0, %c0_i32 : i32, i32
  }
  func.func @transform_1(%arg0: i32) -> (i32, i32) {
    %c0_i32 = arith.constant 0 : i32
    %c0_i32_0 = arith.constant 0 : i32
    %c0_i32_1 = arith.constant 0 : i32
    return %c0_i32, %c0_i32_0 : i32, i32
  }
  func.func @transform_2(%arg0: i32) -> (i32, i32, i32) {
    %c0_i32 = arith.constant 0 : i32
    %c0_i32_0 = arith.constant 0 : i32
    %c0_i32_1 = arith.constant 0 : i32
    return %arg0, %c0_i32, %c0_i32_0 : i32, i32, i32
  }
}

</mosaic_0001>

<bundles_post_ra>
// kernel: tpu_custom_call.1
= control target key start
LH: loop header
LB: loop body
LE: loop exit
PB: predicated region body
PF: predicated region fallthrough
CT: control target
= control target key end

     0   :  { %s502_s13 = smov 16   ;;  %s925_s0 = inlined_call_operand.vmem [shape: f32[128,16], index: 0, kind: input, shape index: {}]   ;;  %s926_s1 = inlined_call_operand.vmem [shape: f32[128,1], index: 1, kind: input, shape index: {}]   ;;  %s927_s2 = inlined_call_operand.hbm [shape: f32[1,8,16], index: 2, kind: output, shape index: {}]  }
   0x1   :  { %v524_v0 = vld [vmem:[%s925_s0 + $0x10] sm:$0xff]  ;;  %v529_v1 = vld [vmem:[%s925_s0] sm:$0xff] }
   0x2   :  { %35 = vrot.lane.b32.xlu1 %v524_v0, %s502_s13  ;;  %29 = vrot.lane.b32.xlu0 %v529_v1, %s502_s13  ;;  %v538_v2 = vld [vmem:[%s925_s0 + $0x20] sm:$0xff] }
   0x3   :  { %41 = vrot.lane.b32.xlu2 %v538_v2, %s502_s13 }
   0x4   :  { %7 = vsyncpa [#allocation3], 0  ;;  %v545_v3 = vld [vmem:[%s925_s0 + $0x18] sm:$0xff]  ;;  %v550_v4 = vld [vmem:[%s925_s0 + $0x8] sm:$0xff]  ;;  %v503_v6 = vmov 0   ;;  %vm28_vm0 = vcmask 1047680  }
   0x5   :  { %v555_v5 = vld [vmem:[%s925_s0 + $0x28] sm:$0xff]  ;;  %474 = vset.pattern.permute.xlu1 %v503_v6  ;;  %473 = vset.pattern.permute.xlu0 %v503_v6  ;;  %v566_v7 = vld [vmem:[%s925_s0 + $0x30] sm:$0xff]  ;;  %v571_v8 = vld [vmem:[%s925_s0 + $0x38] sm:$0xff]  ;;  %vm416_vm2 = vcmask 130048  }
   0x6   :  { %475 = vset.pattern.permute.xlu2 %v503_v6  ;;  %v576_v9 = vld [vmem:[%s925_s0 + $0x40] sm:$0xff]  ;;  %v587_v10 = vld [vmem:[%s925_s0 + $0x48] sm:$0xff]  ;;  %v592_v11 = vld [vmem:[%s925_s0 + $0x50] sm:$0xff] }
   0x7   :  { %v597_v12 = vld [vmem:[%s925_s0 + $0x58] sm:$0xff]  ;;  %v608_v13 = vld [vmem:[%s925_s0 + $0x60] sm:$0xff]  ;;  %v613_v14 = vld [vmem:[%s925_s0 + $0x68] sm:$0xff] }
   0x8   :  { %v618_v15 = vld [vmem:[%s925_s0 + $0x70] sm:$0xff]  ;;  %v629_v16 = vld [vmem:[%s925_s0 + $0x78] sm:$0xff]  ;;  %v305_v17 = vld [vmem:[%s926_s1 + $0x8] sm:$0xff]  ;;  %s460_s0 = sshll.u32 %s927_s2, 4  ;;  %s461_s0 = int_to_ptr.hbm [resolvable:$true] %s460_s0 }
   0x9   :  { %v306_v18 = vld [vmem:[%s926_s1 + $0x10] sm:$0xff]  ;;  %v304_v19 = vld [vmem:[%s926_s1] sm:$0xff]  ;;  %v307_v20 = vld [vmem:[%s926_s1 + $0x18] sm:$0xff] }
   0xa   :  { %38 = vrot.lane.b32.xlu1 %v545_v3, %s502_s13  ;;  %32 = vrot.lane.b32.xlu0 %v550_v4, %s502_s13  ;;  %v308_v21 = vld [vmem:[%s926_s1 + $0x20] sm:$0xff]  ;;  %v309_v22 = vld [vmem:[%s926_s1 + $0x28] sm:$0xff] }
   0xb   :  { %44 = vrot.lane.b32.xlu2 %v555_v5, %s502_s13  ;;  %v310_v23 = vld [vmem:[%s926_s1 + $0x30] sm:$0xff]  ;;  %v311_v24 = vld [vmem:[%s926_s1 + $0x38] sm:$0xff]  ;;  %v312_v25 = vld [vmem:[%s926_s1 + $0x40] sm:$0xff] }
   0xc   :  { %v313_v26 = vld [vmem:[%s926_s1 + $0x48] sm:$0xff]  ;;  %v314_v27 = vld [vmem:[%s926_s1 + $0x50] sm:$0xff]  ;;  %v315_v57 = vld [vmem:[%s926_s1 + $0x58] sm:$0xff] }
   0xd   :  { %v316_v61 = vld [vmem:[%s926_s1 + $0x60] sm:$0xff] }
  0x12   :  { %47 = vrot.lane.b32.xlu0 %v566_v7, %s502_s13  ;;  %50 = vrot.lane.b32.xlu1 %v571_v8, %s502_s13 }
  0x13   :  { %53 = vrot.lane.b32.xlu2 %v576_v9, %s502_s13 }
  0x1a   :  { %56 = vrot.lane.b32.xlu0 %v587_v10, %s502_s13  ;;  %59 = vrot.lane.b32.xlu1 %v592_v11, %s502_s13 }
  0x1b   :  { %62 = vrot.lane.b32.xlu2 %v597_v12, %s502_s13 }
  0x22   :  { %65 = vrot.lane.b32.xlu0 %v608_v13, %s502_s13  ;;  %68 = vrot.lane.b32.xlu1 %v613_v14, %s502_s13 }
  0x23   :  { %71 = vrot.lane.b32.xlu2 %v618_v15, %s502_s13 }
  0x2a   :  { %74 = vrot.lane.b32.xlu0 %v629_v16, %s502_s13  ;;  %327 = vperm.xlu1 %474, %v305_v17  }
  0x2b   :  { %332 = vperm.xlu2 %475, %v306_v18  }
  0x32   :  { %322 = vperm.xlu0 %473, %v304_v19   ;;  %337 = vperm.xlu1 %474, %v307_v20  }
  0x33   :  { %342 = vperm.xlu2 %475, %v308_v21  }
  0x3a   :  { %347 = vperm.xlu0 %473, %v309_v22   ;;  %352 = vperm.xlu1 %474, %v310_v23  }
  0x3b   :  { %357 = vperm.xlu2 %475, %v311_v24  }
  0x42   :  { %362 = vperm.xlu0 %473, %v312_v25   ;;  %367 = vperm.xlu1 %474, %v313_v26  }
  0x43   :  { %372 = vperm.xlu2 %475, %v314_v27  }
  0x5d   :  { %v42_v28 = vpop.permute.xlu2 %41 }
  0x5e   :  { %v43_v44 = vsel %vm28_vm0, %v42_v28, %v538_v2 }
  0x65   :  { %v45_v29 = vpop.permute.xlu2 %44 }
  0x66   :  { %v46_v34 = vsel %vm28_vm0, %v45_v29, %v555_v5 }
  0x6d   :  { %v54_v35 = vpop.permute.xlu2 %53 }
  0x6e   :  { %v55_v40 = vsel %vm28_vm0, %v54_v35, %v576_v9 }
  0x74   :  { %v36_v30 = vpop.permute.xlu1 %35  ;;  %v30_v31 = vpop.permute.xlu0 %29 }
  0x75   :  { %v37_v32 = vsel %vm28_vm0, %v36_v30, %v524_v0  ;;  %v31_v33 = vsel %vm28_vm0, %v30_v31, %v529_v1  ;;  %v63_v45 = vpop.permute.xlu2 %62 }
  0x76   :  { %81 = vrot.lane.b32.xlu0 %v37_v32, %s502_s13  ;;  %77 = vrot.lane.b32.xlu1 %v31_v33, %s502_s13  ;;  %v64_v46 = vsel %vm28_vm0, %v63_v45, %v597_v12 }
  0x7c   :  { %v39_v36 = vpop.permute.xlu1 %38  ;;  %v33_v37 = vpop.permute.xlu0 %32 }
  0x7d   :  { %v40_v38 = vsel %vm28_vm0, %v39_v36, %v545_v3  ;;  %v34_v39 = vsel %vm28_vm0, %v33_v37, %v550_v4  ;;  %v72_v51 = vpop.permute.xlu2 %71 }
  0x7e   :  { %87 = vrot.lane.b32.xlu0 %v46_v34, %s502_s13  ;;  %83 = vrot.lane.b32.xlu1 %v40_v38, %s502_s13  ;;  %v73_v52 = vsel %vm28_vm0, %v72_v51, %v618_v15 }
  0x7f   :  { %79 = vrot.lane.b32.xlu2 %v34_v39, %s502_s13 }
  0x84   :  { %v48_v41 = vpop.permute.xlu0 %47  ;;  %v51_v43 = vpop.permute.xlu1 %50 }
  0x85   :  { %v49_v42 = vsel %vm28_vm0, %v48_v41, %v566_v7  ;;  %v52_v48 = vsel %vm28_vm0, %v51_v43, %v571_v8  ;;  %v720_v62 = vpop.permute.xlu2 %332 }
  0x86   :  { %93 = vrot.lane.b32.xlu0 %v55_v40, %s502_s13  ;;  %89 = vrot.lane.b32.xlu1 %v49_v42, %s502_s13 }
  0x87   :  { %85 = vrot.lane.b32.xlu2 %v43_v44, %s502_s13 }
  0x8c   :  { %v57_v47 = vpop.permute.xlu0 %56  ;;  %v60_v50 = vpop.permute.xlu1 %59 }
  0x8d   :  { %v58_v49 = vsel %vm28_vm0, %v57_v47, %v587_v10  ;;  %v61_v54 = vsel %vm28_vm0, %v60_v50, %v592_v11  ;;  %v722_v63 = vpop.permute.xlu2 %342 }
  0x8e   :  { %99 = vrot.lane.b32.xlu0 %v64_v46, %s502_s13  ;;  %95 = vrot.lane.b32.xlu1 %v58_v49, %s502_s13  ;;  %v318_v49 = vld [vmem:[%s926_s1 + $0x70] sm:$0xff] }
  0x8f   :  { %91 = vrot.lane.b32.xlu2 %v52_v48, %s502_s13 }
  0x94   :  { %v66_v53 = vpop.permute.xlu0 %65  ;;  %v69_v56 = vpop.permute.xlu1 %68 }
  0x95   :  { %v67_v55 = vsel %vm28_vm0, %v66_v53, %v608_v13  ;;  %v70_v59 = vsel %vm28_vm0, %v69_v56, %v613_v14  ;;  %v726_v17 = vpop.permute.xlu2 %357  ;;  %v319_v56 = vld [vmem:[%s926_s1 + $0x78] sm:$0xff] }
  0x96   :  { %105 = vrot.lane.b32.xlu0 %v73_v52, %s502_s13  ;;  %101 = vrot.lane.b32.xlu1 %v67_v55, %s502_s13 }
  0x97   :  { %97 = vrot.lane.b32.xlu2 %v61_v54, %s502_s13 }
  0x9c   :  { %v75_v58 = vpop.permute.xlu0 %74  ;;  %v724_v6 = vpop.permute.xlu1 %327 }
  0x9d   :  { %v76_v60 = vsel %vm28_vm0, %v75_v58, %v629_v16  ;;  %v732_v20 = vpop.permute.xlu2 %372 }
  0x9e   :  { %377 = vperm.xlu0 %473, %v315_v57   ;;  %107 = vrot.lane.b32.xlu1 %v76_v60, %s502_s13  ;;  %v141_v60 = vlaneseq }
  0x9f   :  { %103 = vrot.lane.b32.xlu2 %v70_v59, %s502_s13  ;;  %s504_s13 = smov 127   ;;  %v317_v59 = vld [vmem:[%s926_s1 + $0x68] sm:$0xff]  ;;  %s505_s1 = smov [#allocation2]  }
  0xa0   :  { %s458_s19 = sshll.u32 %s505_s1, 4  ;;  %s459_s19 = int_to_ptr.vmem [resolvable:$true] %s458_s19 }
  0xa4   :  { %v728_v18 = vpop.permute.xlu0 %322  ;;  %v730_v19 = vpop.permute.xlu1 %337 }
  0xa6   :  { %382 = vperm.xlu1 %474, %v316_v61  }
  0xac   :  { %v734_v21 = vpop.permute.xlu0 %347  ;;  %v736_v22 = vpop.permute.xlu1 %352 }
  0xb4   :  { %v741_v25 = vpop.permute.xlu0 %362  ;;  %v743_v26 = vpop.permute.xlu1 %367 }
  0xd9   :  { %v80_v23 = vpop.permute.xlu2 %79 }
  0xda   :  { %v110_v24 = vsel %vm28_vm0, %v80_v23, %v550_v4 }
  0xdb   :  { %178 = vrot.lane.b32.xlu0 %v110_v24, %s504_s13  ;;  %v802_v24 = vshrl.u32 %v141_v60, 7 }
  0xdd   :  { %vm143_vm1 = vcmp.lt.s32.totalorder %v802_v24, 7 }
  0xe1   :  { %v86_v27 = vpop.permute.xlu2 %85 }
  0xe2   :  { %v113_v28 = vsel %vm28_vm0, %v86_v27, %v538_v2  ;;  %v127_v27 = vrot.slane %v524_v0, 1 }
  0xe3   :  { %184 = vrot.lane.b32.xlu0 %v113_v28, %s504_s13  ;;  %v126_v28 = vrot.slane %v550_v4, 1 }
  0xe8   :  { %v78_v29 = vpop.permute.xlu1 %77  ;;  %v82_v30 = vpop.permute.xlu0 %81 }
  0xe9   :  { %v92_v31 = vpop.permute.xlu2 %91  ;;  %v109_v32 = vsel %vm28_vm0, %v78_v29, %v529_v1  ;;  %v111_v33 = vsel %vm28_vm0, %v82_v30, %v524_v0  ;;  %v125_v29 = vrot.slane %v529_v1, 1 }
  0xea   :  { %176 = vrot.lane.b32.xlu2 %v109_v32, %s504_s13  ;;  %v116_v34 = vsel %vm28_vm0, %v92_v31, %v571_v8  ;;  %180 = vrot.lane.b32.xlu1 %v111_v33, %s504_s13  ;;  %v157_v32 = vsel %vm143_vm1, %v126_v28, %v127_v27 }
  0xeb   :  { %190 = vrot.lane.b32.xlu0 %v116_v34, %s504_s13  ;;  %v158_v33 = vsel %vm143_vm1, %v125_v29, %v126_v28  ;;  %v128_v34 = vrot.slane %v545_v3, 1 }
  0xf0   :  { %v84_v35 = vpop.permute.xlu1 %83  ;;  %v88_v36 = vpop.permute.xlu0 %87 }
  0xf1   :  { %v98_v37 = vpop.permute.xlu2 %97  ;;  %v112_v38 = vsel %vm28_vm0, %v84_v35, %v545_v3  ;;  %v114_v39 = vsel %vm28_vm0, %v88_v36, %v555_v5  ;;  %v129_v35 = vrot.slane %v538_v2, 1  ;;  %v241_v36 = vsub.f32 %v550_v4, %v157_v32 }
  0xf2   :  { %182 = vrot.lane.b32.xlu2 %v112_v38, %s504_s13  ;;  %v119_v40 = vsel %vm28_vm0, %v98_v37, %v592_v11  ;;  %186 = vrot.lane.b32.xlu1 %v114_v39, %s504_s13  ;;  %v240_v39 = vsub.f32 %v529_v1, %v158_v33 }
  0xf3   :  { %196 = vrot.lane.b32.xlu0 %v119_v40, %s504_s13  ;;  %v155_v40 = vsel %vm143_vm1, %v128_v34, %v129_v35 }
  0xf8   :  { %v90_v41 = vpop.permute.xlu1 %89  ;;  %v94_v42 = vpop.permute.xlu0 %93 }
  0xf9   :  { %v104_v43 = vpop.permute.xlu2 %103  ;;  %v115_v44 = vsel %vm28_vm0, %v90_v41, %v566_v7  ;;  %v117_v45 = vsel %vm28_vm0, %v94_v42, %v576_v9  ;;  %v130_v41 = vrot.slane %v555_v5, 1 }
  0xfa   :  { %v122_v46 = vsel %vm28_vm0, %v104_v43, %v613_v14  ;;  %188 = vrot.lane.b32.xlu2 %v115_v44, %s504_s13  ;;  %192 = vrot.lane.b32.xlu1 %v117_v45, %s504_s13  ;;  %v273_v44 = vmul.f32 %v241_v36, %v241_v36 }
  0xfb   :  { %202 = vrot.lane.b32.xlu0 %v122_v46, %s504_s13  ;;  %v131_v46 = vrot.slane %v566_v7, 1 }
 0x100   :  { %v96_v47 = vpop.permute.xlu1 %95  ;;  %v100_v48 = vpop.permute.xlu0 %99 }
 0x101   :  { %v118_v50 = vsel %vm28_vm0, %v96_v47, %v587_v10  ;;  %v120_v51 = vsel %vm28_vm0, %v100_v48, %v597_v12  ;;  %v132_v47 = vrot.slane %v571_v8, 1 }
 0x102   :  { %194 = vrot.lane.b32.xlu2 %v118_v50, %s504_s13  ;;  %198 = vrot.lane.b32.xlu1 %v120_v51, %s504_s13  ;;  %v243_v50 = vsub.f32 %v545_v3, %v155_v40  ;;  %v156_v51 = vsel %vm143_vm1, %v127_v27, %v128_v34 }
 0x103   :  { %392 = vperm.xlu0 %473, %v318_v49   ;;  %v272_v49 = vmul.f32 %v240_v39, %v240_v39 }
 0x108   :  { %v102_v52 = vpop.permute.xlu1 %101  ;;  %v106_v53 = vpop.permute.xlu0 %105 }
 0x109   :  { %v121_v54 = vsel %vm28_vm0, %v102_v52, %v608_v13  ;;  %v123_v55 = vsel %vm28_vm0, %v106_v53, %v618_v15  ;;  %v154_v53 = vsel %vm143_vm1, %v129_v35, %v130_v41 }
 0x10a   :  { %200 = vrot.lane.b32.xlu2 %v121_v54, %s504_s13  ;;  %204 = vrot.lane.b32.xlu1 %v123_v55, %s504_s13  ;;  %v152_v55 = vsel %vm143_vm1, %v131_v46, %v132_v47 }
 0x110   :  { %v108_v57 = vpop.permute.xlu1 %107  ;;  %v799_v23 = vpop.permute.xlu0 %377 }
 0x111   :  { %v124_v58 = vsel %vm28_vm0, %v108_v57, %v629_v16  ;;  %v133_v57 = vrot.slane %v576_v9, 1 }
 0x112   :  { %206 = vrot.lane.b32.xlu2 %v124_v58, %s504_s13  ;;  %397 = vperm.xlu1 %474, %v319_v56   ;;  %v242_v56 = vsub.f32 %v524_v0, %v156_v51 }
 0x113   :  { %v151_v36 = vsel %vm143_vm1, %v132_v47, %v133_v57 }
 0x114   :  { %v274_v34 = vmul.f32 %v242_v56, %v242_v56 }
 0x118   :  { %v823_v42 = vpop.permute.xlu1 %382 }
 0x11a   :  { %387 = vperm.xlu2 %475, %v317_v59   ;;  %v275_v59 = vmul.f32 %v243_v50, %v243_v50 }
 0x144   :  { %v177_v61 = vpop.permute.xlu2 %176 }
 0x145   :  { %v224_v38 = vsub.f32 %v529_v1, %v177_v61  ;;  %v244_v61 = vsub.f32 %v538_v2, %v154_v53 }
 0x14c   :  { %v183_v30 = vpop.permute.xlu2 %182 }
 0x14d   :  { %v179_v31 = vpop.permute.xlu0 %178  ;;  %v227_v52 = vsub.f32 %v545_v3, %v183_v30  ;;  %v134_v3 = vrot.slane %v587_v10, 1  ;;  %v135_v30 = vrot.slane %v592_v11, 1 }
 0x14e   :  { %v225_v37 = vsub.f32 %v550_v4, %v179_v31  ;;  %v256_v4 = vmul.f32 %v224_v38, %v224_v38  ;;  %v246_v31 = vsub.f32 %v566_v7, %v152_v55  ;;  %v276_v38 = vmul.f32 %v244_v61, %v244_v61 }
 0x14f   :  { %v259_v28 = vmul.f32 %v227_v52, %v227_v52 }
 0x150   :  { %v257_v45 = vmul.f32 %v225_v37, %v225_v37  ;;  %v288_v58 = vadd.f32 %v272_v49, %v256_v4  ;;  %v278_v50 = vmul.f32 %v246_v31, %v246_v31 }
 0x152   :  { %v289_v54 = vadd.f32 %v273_v44, %v257_v45  ;;  %v400_v37 = vmul.f32 %v728_v18, %v288_v58  ;;  %v153_v44 = vsel %vm143_vm1, %v130_v41, %v131_v46  ;;  %v291_v45 = vadd.f32 %v275_v59, %v259_v28 }
 0x153   :  { %v245_v18 = vsub.f32 %v555_v5, %v153_v44  ;;  %v137_v58 = vrot.slane %v608_v13, 1  ;;  %v138_v59 = vrot.slane %v613_v14, 1 }
 0x154   :  { %v189_v43 = vpop.permute.xlu2 %188  ;;  %v401_v33 = vmul.f32 %v724_v6, %v289_v54  ;;  %v149_v6 = vsel %vm143_vm1, %v134_v3, %v135_v30  ;;  %v403_v46 = vmul.f32 %v730_v19, %v291_v45 }
 0x155   :  { %v185_v48 = vpop.permute.xlu0 %184  ;;  %v249_v41 = vsub.f32 %v587_v10, %v149_v6 }
 0x156   :  { %v228_v27 = vsub.f32 %v538_v2, %v185_v48  ;;  %v230_v2 = vsub.f32 %v566_v7, %v189_v43  ;;  %v418_v47 = vsel %vm416_vm2, %v401_v33, 0.0  ;;  %v136_v7 = vrot.slane %v597_v12, 1 }
 0x157   :  { %v417_v43 = vsel %vm416_vm2, %v400_v37, 0.0 }
 0x158   :  { %v260_v48 = vmul.f32 %v228_v27, %v228_v27  ;;  %v262_v51 = vmul.f32 %v230_v2, %v230_v2  ;;  %v419_v55 = vadd.f32 %v418_v47, %v417_v43  ;;  %v277_v27 = vmul.f32 %v245_v18, %v245_v18 }
 0x159   :  { %v148_v19 = vsel %vm143_vm1, %v135_v30, %v136_v7  ;;  %v146_v30 = vsel %vm143_vm1, %v137_v58, %v138_v59 }
 0x15a   :  { %v292_v52 = vadd.f32 %v276_v38, %v260_v48 }
 0x15c   :  { %v181_v32 = vpop.permute.xlu1 %180  ;;  %v195_v39 = vpop.permute.xlu2 %194 }
 0x15d   :  { %v226_v35 = vsub.f32 %v524_v0, %v181_v32  ;;  %v191_v40 = vpop.permute.xlu0 %190  ;;  %v247_v0 = vsub.f32 %v571_v8, %v151_v36  ;;  %v294_v32 = vadd.f32 %v278_v50, %v262_v51 }
 0x15e   :  { %v231_v54 = vsub.f32 %v571_v8, %v191_v40  ;;  %v150_v8 = vsel %vm143_vm1, %v133_v57, %v134_v3  ;;  %v281_v3 = vmul.f32 %v249_v41, %v249_v41 }
 0x15f   :  { %v258_v4 = vmul.f32 %v226_v35, %v226_v35  ;;  %v279_v56 = vmul.f32 %v247_v0, %v247_v0  ;;  %v404_v35 = vmul.f32 %v722_v63, %v292_v52  ;;  %v406_v57 = vmul.f32 %v736_v22, %v294_v32 }
 0x160   :  { %v263_v36 = vmul.f32 %v231_v54, %v231_v54  ;;  %v252_v0 = vsub.f32 %v608_v13, %v146_v30 }
 0x161   :  { %v290_v49 = vadd.f32 %v274_v34, %v258_v4  ;;  %v422_v34 = vsel %vm416_vm2, %v403_v46, 0.0  ;;  %v424_v63 = vsel %vm416_vm2, %v404_v35, 0.0 }
 0x162   :  { %v295_v48 = vadd.f32 %v279_v56, %v263_v36 }
 0x163   :  { %v402_v53 = vmul.f32 %v720_v62, %v290_v49  ;;  %v233_v62 = vsub.f32 %v587_v10, %v195_v39  ;;  %v248_v10 = vsub.f32 %v576_v9, %v150_v8  ;;  %v139_v39 = vrot.slane %v618_v15, 1 }
 0x164   :  { %v187_v61 = vpop.permute.xlu1 %186  ;;  %v201_v38 = vpop.permute.xlu2 %200 }
 0x165   :  { %v420_v28 = vsel %vm416_vm2, %v402_v53, 0.0  ;;  %v229_v31 = vsub.f32 %v555_v5, %v187_v61  ;;  %v250_v5 = vsub.f32 %v592_v11, %v148_v19  ;;  %v197_v40 = vpop.permute.xlu0 %196  ;;  %v265_v45 = vmul.f32 %v233_v62, %v233_v62 }
 0x166   :  { %v421_v33 = vadd.f32 %v420_v28, %v419_v55  ;;  %v234_v4 = vsub.f32 %v592_v11, %v197_v40  ;;  %v280_v50 = vmul.f32 %v248_v10, %v248_v10  ;;  %v145_v22 = vsel %vm143_vm1, %v138_v59, %v139_v39 }
 0x167   :  { %v261_v37 = vmul.f32 %v229_v31, %v229_v31  ;;  %v282_v49 = vmul.f32 %v250_v5, %v250_v5  ;;  %v297_v41 = vadd.f32 %v281_v3, %v265_v45  ;;  %v236_v46 = vsub.f32 %v608_v13, %v201_v38 }
 0x168   :  { %v423_v2 = vadd.f32 %v422_v34, %v421_v33  ;;  %v147_v11 = vsel %vm143_vm1, %v136_v7, %v137_v58  ;;  %v407_v53 = vmul.f32 %v726_v17, %v295_v48  ;;  %v266_v54 = vmul.f32 %v234_v4, %v234_v4 }
 0x169   :  { %v293_v44 = vadd.f32 %v277_v27, %v261_v37  ;;  %v251_v28 = vsub.f32 %v597_v12, %v147_v11  ;;  %v409_v59 = vmul.f32 %v743_v26, %v297_v41  ;;  %v284_v27 = vmul.f32 %v252_v0, %v252_v0 }
 0x16a   :  { %v425_v47 = vadd.f32 %v424_v63, %v423_v2  ;;  %v268_v13 = vmul.f32 %v236_v46, %v236_v46  ;;  %v140_v7 = vrot.slane %v629_v16, 1  ;;  %v430_v58 = vsel %vm416_vm2, %v407_v53, 0.0 }
 0x16b   :  { %v405_v6 = vmul.f32 %v734_v21, %v293_v44  ;;  %v428_v21 = vsel %vm416_vm2, %v406_v57, 0.0  ;;  %v298_v32 = vadd.f32 %v282_v49, %v266_v54  ;;  %v283_v36 = vmul.f32 %v251_v28, %v251_v28 }
 0x16c   :  { %v193_v18 = vpop.permute.xlu1 %192  ;;  %v207_v31 = vpop.permute.xlu2 %206  ;;  %v300_v37 = vadd.f32 %v284_v27, %v268_v13  ;;  %v144_v38 = vsel %vm143_vm1, %v139_v39, %v140_v7  ;;  %v449_v46 = vand.u32 127, %v141_v60 }
 0x16d   :  { %v426_v43 = vsel %vm416_vm2, %v405_v6, 0.0  ;;  %v232_v51 = vsub.f32 %v576_v9, %v193_v18  ;;  %v253_v9 = vsub.f32 %v613_v14, %v145_v22  ;;  %v203_v19 = vpop.permute.xlu0 %202  ;;  %v410_v5 = vmul.f32 %v732_v20, %v298_v32 }
 0x16e   :  { %v427_v52 = vadd.f32 %v426_v43, %v425_v47  ;;  %v237_v62 = vsub.f32 %v613_v14, %v203_v19  ;;  %v434_v14 = vsel %vm416_vm2, %v409_v59, 0.0  ;;  %v412_v57 = vmul.f32 %v823_v42, %v300_v37 }
 0x16f   :  { %v264_v55 = vmul.f32 %v232_v51, %v232_v51  ;;  %v285_v35 = vmul.f32 %v253_v9, %v253_v9  ;;  %v436_v39 = vsel %vm416_vm2, %v410_v5, 0.0  ;;  %v239_v1 = vsub.f32 %v629_v16, %v207_v31 }
 0x170   :  { %v429_v56 = vadd.f32 %v428_v21, %v427_v52  ;;  %v269_v40 = vmul.f32 %v237_v62, %v237_v62  ;;  %v440_v42 = vsel %vm416_vm2, %v412_v57, 0.0  ;;  %vm450_vm3 = vcmp.ne.s32.totalorder %v449_v46, 15 }
 0x171   :  { %v296_v61 = vadd.f32 %v280_v50, %v264_v55  ;;  %v271_v49 = vmul.f32 %v239_v1, %v239_v1 }
 0x172   :  { %v431_v33 = vadd.f32 %v430_v58, %v429_v56  ;;  %v301_v24 = vadd.f32 %v285_v35, %v269_v40 }
 0x173   :  { %v408_v17 = vmul.f32 %v741_v25, %v296_v61  ;;  %v159_v25 = vsel %vm143_vm1, %v140_v7, %v125_v29 }
 0x174   :  { %v199_v8 = vpop.permute.xlu1 %198  ;;  %v255_v3 = vsub.f32 %v629_v16, %v159_v25  ;;  %v388_v45 = vpop.permute.xlu2 %387 }
 0x175   :  { %v432_v34 = vsel %vm416_vm2, %v408_v17, 0.0  ;;  %v235_v26 = vsub.f32 %v597_v12, %v199_v8  ;;  %v254_v12 = vsub.f32 %v618_v15, %v144_v38  ;;  %v413_v18 = vmul.f32 %v388_v45, %v301_v24  ;;  %v393_v51 = vpop.permute.xlu0 %392 }
 0x176   :  { %v433_v2 = vadd.f32 %v432_v34, %v431_v33  ;;  %v287_v47 = vmul.f32 %v255_v3, %v255_v3 }
 0x177   :  { %v267_v30 = vmul.f32 %v235_v26, %v235_v26  ;;  %v286_v6 = vmul.f32 %v254_v12, %v254_v12 }
 0x178   :  { %v435_v44 = vadd.f32 %v434_v14, %v433_v2  ;;  %v303_v41 = vadd.f32 %v287_v47, %v271_v49 }
 0x179   :  { %v299_v10 = vadd.f32 %v283_v36, %v267_v30 }
 0x17a   :  { %v437_v63 = vadd.f32 %v436_v39, %v435_v44 }
 0x17b   :  { %v411_v29 = vmul.f32 %v799_v23, %v299_v10  ;;  %v442_v23 = vsel %vm416_vm2, %v413_v18, 0.0 }
 0x17c   :  { %v205_v20 = vpop.permute.xlu1 %204 }
 0x17d   :  { %v438_v48 = vsel %vm416_vm2, %v411_v29, 0.0  ;;  %v238_v4 = vsub.f32 %v618_v15, %v205_v20 }
 0x17e   :  { %v439_v0 = vadd.f32 %v438_v48, %v437_v63 }
 0x17f   :  { %v270_v43 = vmul.f32 %v238_v4, %v238_v4 }
 0x180   :  { %v441_v50 = vadd.f32 %v440_v42, %v439_v0 }
 0x181   :  { %v302_v16 = vadd.f32 %v286_v6, %v270_v43 }
 0x182   :  { %v443_v11 = vadd.f32 %v442_v23, %v441_v50 }
 0x183   :  { %v414_v22 = vmul.f32 %v393_v51, %v302_v16 }
 0x184   :  { %v398_v52 = vpop.permute.xlu1 %397 }
 0x185   :  { %v415_v21 = vmul.f32 %v398_v52, %v303_v41  ;;  %v444_v15 = vsel %vm416_vm2, %v414_v22, 0.0 }
 0x186   :  { %v445_v53 = vadd.f32 %v444_v15, %v443_v11 }
 0x187   :  { %v446_v54 = vsel %vm416_vm2, %v415_v21, 0.0 }
 0x188   :  { %v447_v55 = vadd.f32 %v446_v54, %v445_v53 }
 0x18a   :  { %v451_v56 = vsel %vm450_vm3, %v447_v55, 0.0 }
 0x18b   :  { %452 = vst.msk [vmem:[#allocation2] sm:$0xff] %vm416_vm2, %v451_v56 }
 0x18c   :  { %463 = dma.vmem_to_hbm [thread:$0]  %s459_s19, 128, %s461_s0, [#allocation3]  }
 0x18d   :  { %500 = dma.done.wait [#allocation3], 128  }
 0x18e   :  { %501 = vsyncadd [#allocation3], 4294967168 }
 0x18f   :  { %468 = vsyncpa [#allocation3], 1 }

</bundles_post_ra>
